<compile_context>
chip_gen: v7x
topology: tpu7x:2x2x1
jax: 0.10.0
libtpu: 0.0.40
codegen_flags: <defaults>
</compile_context>

<pallas_src>
import jax
import jax.numpy as jnp
from jax.experimental import pallas as pl
from jax.experimental.pallas import tpu as pltpu

POOL = 10                              # avg_pool2d kernel size (10, 10), floor mode
EPS = 1e-6                             # GeM eps
MAX_ROW_TILE = 512                     # 512-row tiles already ~85% of HBM roofline
MIN_GRID_STEPS = 4                     # >=4 steps: dual-TC sharding + DMA/compute overlap
VMEM_TILE_BUDGET = 12 * 1024 * 1024    # fits v5e's 16 MiB default scoped VMEM w/ headroom
VMEM_LIMIT_BYTES = 32 * 1024 * 1024    # explicit scoped-VMEM limit (<= v7x 64 MiB physical)


def _round_up(a, m):
    return ((a + m - 1) // m) * m


def gem_kernel(scal_ref, x_ref, pm_ref, o_ref):
    # scal_ref: (3,) f32 in SMEM: [p, 1/p, p_is_3_flag]
    # x_ref:    (row_tile, POOL*W) f32 VMEM; row = one (b, c, oh) strip, hi-major/w-minor
    # pm_ref:   (POOL*W, OW) f32 VMEM; constant 0/1 pooling matrix (W-crop folded in)
    # o_ref:    (row_tile, OW) f32 VMEM
    p = scal_ref[0]
    inv_p = scal_ref[1]
    p_is_3 = scal_ref[2]

    # NOTE: on a partial tail block the out-of-range rows hold unspecified VMEM data;
    # whatever is computed on them (possibly NaN) is masked out of the writeback by
    # Pallas. Do NOT "fix" this into an explicit store.
    x = jnp.maximum(x_ref[...], jnp.float32(EPS))          # clamp(min=eps)

    def pool_and_store(xp):
        # 10x10 window sum == one MXU matmul against the constant 0/1 pooling matrix.
        # HIGHEST precision keeps f32 x^p from being truncated to bf16 before the
        # 100-element window sum (MXU is nowhere near the bottleneck).
        s = jnp.dot(xp, pm_ref[...],
                    preferred_element_type=jnp.float32,
                    precision=jax.lax.Precision.HIGHEST)
        m = s * jnp.float32(1.0 / (POOL * POOL))            # window mean
        o_ref[...] = jnp.exp(jnp.log(m) * inv_p)            # m ** (1/p), tiny EUP epilogue

    @pl.when(p_is_3 > 0.5)
    def _():
        # VPU-only fast path for the default p == 3: no per-element EUP log/exp.
        pool_and_store(x * x * x)

    @pl.when(p_is_3 <= 0.5)
    def _():
        pool_and_store(jnp.exp(p * jnp.log(x)))             # general x ** p (x > 0 after clamp)


def gem_forward(x, p):
    """GeM forward. x: (B, C, H, W), p: (1,). Returns (B, C*(H//10)*(W//10)) float32."""
    B, C, H, W = x.shape
    OH, OW = H // POOL, W // POOL
    if OH == 0 or OW == 0:
        return jnp.zeros((B, 0), jnp.float32)
    Hc = OH * POOL
    K = POOL * W                       # strip width (full W; W-crop handled by pool_mat)
    R = B * C * OH                     # number of 10-row strips

    xf = x.astype(jnp.float32)
    if H == Hc:
        # Fully free, order-preserving collapse -- no extra HBM traffic before the kernel.
        rows = xf.reshape(R, K)
    else:
        # TODO(synk): fold the H-crop into a BlockSpec index_map over a (B*C, H, W) view to
        # avoid this extra HBM copy when H % 10 != 0.
        rows = xf[:, :, :Hc, :].reshape(R, K)

    # Constant 0/1 pooling matrix over the FULL width: column ow selects (hi, w) with
    # w // 10 == ow. Columns with w >= OW*10 never match -> floor-mode W-crop for free.
    w_idx = jnp.arange(K) % W
    pool_mat = (w_idx[:, None] // POOL == jnp.arange(OW)[None, :]).astype(jnp.float32)

    # SMEM scalars: [p, 1/p, p==3 flag] (flag selects the VPU-only cube fast path at runtime).
    p0 = p.reshape(()).astype(jnp.float32)
    p_is_3 = (jnp.abs(p0 - 3.0) < 1e-6).astype(jnp.float32)
    scal = jnp.stack([p0, 1.0 / p0, p_is_3])

    # --- Row-tile sizing from a VMEM budget ---------------------------------------------
    # Per resident row: 2x input (double-buffered) + 1x materialized x^p temp + 2x output.
    per_row_bytes = (3 * K + 2 * OW) * 4
    fixed_bytes = K * OW * 4                                   # resident pooling matrix
    # TODO(synk): for extremely wide inputs (W >~ 1500) split the K axis with an
    # accumulating scratch instead of keeping the whole strip + pool_mat resident.
    budget_rows = max((VMEM_TILE_BUDGET - fixed_bytes) // per_row_bytes, 8)
    # Keep >= MIN_GRID_STEPS grid steps so both v7x TensorCores get work and input DMA
    # pipelines against compute (instead of prologue -> compute -> epilogue).
    step_rows = _round_up(pl.cdiv(R, MIN_GRID_STEPS), 8)
    row_tile = min(MAX_ROW_TILE, int(budget_rows), step_rows)
    row_tile = max(8, (row_tile // 8) * 8)                     # sublane-aligned
    if R <= 8:
        row_tile = R                                           # single exact block
    grid = (pl.cdiv(R, row_tile),)

    n_elem = R * K
    cost = pl.CostEstimate(
        flops=4 * n_elem + 2 * n_elem * OW + 3 * R * OW,
        transcendentals=2 * n_elem + 2 * R * OW,
        bytes_accessed=4 * (n_elem + R * OW + K * OW),
    )

    out = pl.pallas_call(
        gem_kernel,
        out_shape=jax.ShapeDtypeStruct((R, OW), jnp.float32),
        grid=grid,
        in_specs=[
            pl.BlockSpec(memory_space=pltpu.MemorySpace.SMEM),   # [p, 1/p, flag]
            pl.BlockSpec((row_tile, K), lambda i: (i, 0)),       # input strips
            pl.BlockSpec((K, OW), lambda i: (0, 0)),             # pooling matrix (resident)
        ],
        out_specs=pl.BlockSpec((row_tile, OW), lambda i: (i, 0)),
        compiler_params=pltpu.CompilerParams(
            dimension_semantics=("parallel",),
            vmem_limit_bytes=VMEM_LIMIT_BYTES,
        ),
        cost_estimate=cost,
    )(scal, rows, pool_mat)

    # Rows are (b, c, oh)-ordered, columns are ow -> matches torch's x.view(B, -1).
    return out.reshape(B, C * OH * OW)


def gem_reference(x, p):
    """Pure-JAX reference mirroring the PyTorch forward."""
    B, C, H, W = x.shape
    OH, OW = H // POOL, W // POOL
    xc = x[:, :, : OH * POOL, : OW * POOL].astype(jnp.float32)
    xp = jnp.clip(xc, EPS, None) ** p[0]
    pooled = xp.reshape(B, C, OH, POOL, OW, POOL).mean(axis=(3, 5))
    return (pooled ** (1.0 / p[0])).reshape(B, -1)


if __name__ == "__main__":
    key = jax.random.PRNGKey(0)
    k1, k2 = jax.random.split(key)

    # Deterministic parameter init: p = ones(1) * 3  (as in nn.Parameter(torch.ones(1)*p))
    p3 = jnp.ones((1,), dtype=jnp.float32) * 3.0

    # Case 1: H, W exact multiples of the pool size (2x2 output windows per channel),
    # exercises the zero-copy collapse + integer-p (cube) fast path + multi-step grid.
    B, C, H, W = 2, 4, 20, 20
    x1 = jax.random.normal(k1, (B, C, H, W), dtype=jnp.float32)
    out1 = gem_forward(x1, p3)
    jax.block_until_ready(out1)
    ref1 = gem_reference(x1, p3)
    assert out1.shape == (B, C * (H // POOL) * (W // POOL))
    assert jnp.allclose(out1, ref1, rtol=1e-4, atol=1e-5), "mismatch vs reference (case 1)"

    # Case 2: ragged spatial dims (floor-mode crop; W-crop handled inside the kernel via
    # the pooling matrix) and a row count that's not a multiple of the row tile.
    B2, C2, H2, W2 = 2, 3, 23, 31
    x2 = jax.random.normal(k2, (B2, C2, H2, W2), dtype=jnp.float32)
    out2 = gem_forward(x2, p3)
    jax.block_until_ready(out2)
    ref2 = gem_reference(x2, p3)
    assert out2.shape == (B2, C2 * (H2 // POOL) * (W2 // POOL))
    assert jnp.allclose(out2, ref2, rtol=1e-4, atol=1e-5), "mismatch vs reference (case 2)"

    # Case 3: non-integer p exercises the general exp(p*log(x)) path at runtime.
    p25 = jnp.ones((1,), dtype=jnp.float32) * 2.5
    out3 = gem_forward(x1, p25)
    jax.block_until_ready(out3)
    ref3 = gem_reference(x1, p25)
    assert jnp.allclose(out3, ref3, rtol=1e-4, atol=1e-5), "mismatch vs reference (case 3)"

    print("KERNEL_OK")
</pallas_src>

<mosaic_0001>
module attributes {stable_mosaic.version = 11 : i64} {
  func.func @gem_kernel(%arg0: i32, %arg1: memref<3xf32, #tpu.memory_space<smem>>, %arg2: memref<8x200xf32, #tpu.memory_space<vmem>>, %arg3: memref<200x2xf32, #tpu.memory_space<vmem>>, %arg4: memref<8x2xf32, #tpu.memory_space<vmem>>) attributes {dimension_semantics = [#tpu.dimension_semantics<parallel>], iteration_bounds = array<i64: 2>, scalar_prefetch = 0 : i64, scratch_operands = 0 : i64, tpu.core_type = #tpu.core_type<tc>, window_params = [{transform_indices = @transform_0, window_bounds = array<i64: 3>}, {transform_indices = @transform_1, window_bounds = array<i64: 8, 200>}, {pipeline_mode = #tpu.pipeline_mode<synchronous>, transform_indices = @transform_2, window_bounds = array<i64: 200, 2>}, {transform_indices = @transform_3, window_bounds = array<i64: 8, 2>}]} {
    %c0 = arith.constant 0 : index
    %0 = memref.load %arg1[%c0] : memref<3xf32, #tpu.memory_space<smem>>
    %c1 = arith.constant 1 : index
    %1 = memref.load %arg1[%c1] : memref<3xf32, #tpu.memory_space<smem>>
    %c2 = arith.constant 2 : index
    %2 = memref.load %arg1[%c2] : memref<3xf32, #tpu.memory_space<smem>>
    %c0_0 = arith.constant 0 : index
    %c0_1 = arith.constant 0 : index
    %3 = vector.load %arg2[%c0_0, %c0_1] : memref<8x200xf32, #tpu.memory_space<vmem>>, vector<8x200xf32>
    %cst = arith.constant 9.99999997E-7 : f32
    %4 = vector.broadcast %cst : f32 to vector<8x200xf32>
    %5 = arith.maximumf %3, %4 : vector<8x200xf32>
    %cst_2 = arith.constant 5.000000e-01 : f32
    %6 = arith.cmpf ogt, %2, %cst_2 : f32
    %7 = arith.extui %6 : i1 to i32
    %c0_i32 = arith.constant 0 : i32
    %8 = arith.cmpi ne, %7, %c0_i32 : i32
    scf.if %8 {
      %12 = arith.mulf %5, %5 : vector<8x200xf32>
      %13 = arith.mulf %12, %5 : vector<8x200xf32>
      %c0_5 = arith.constant 0 : index
      %c0_6 = arith.constant 0 : index
      %14 = vector.load %arg3[%c0_5, %c0_6] : memref<200x2xf32, #tpu.memory_space<vmem>>, vector<200x2xf32>
      %cst_7 = arith.constant dense<0.000000e+00> : vector<8x2xf32>
      %15 = tpu.matmul %13, %14, %cst_7 {dimension_numbers = #tpu.dot_dimension_numbers<[1], [0], [0], [1], [0, 0, 1, 1], [], []>, precision = #tpu.contract_precision<fp32>} : vector<8x200xf32>, vector<200x2xf32>, vector<8x2xf32> -> vector<8x2xf32>
      %cst_8 = arith.constant 0.00999999977 : f32
      %16 = vector.broadcast %cst_8 : f32 to vector<8x2xf32>
      %17 = arith.mulf %15, %16 : vector<8x2xf32>
      %18 = math.log %17 : vector<8x2xf32>
      %19 = vector.broadcast %1 : f32 to vector<8x2xf32>
      %20 = arith.mulf %18, %19 : vector<8x2xf32>
      %21 = math.exp %20 : vector<8x2xf32>
      %c0_9 = arith.constant 0 : index
      %c0_10 = arith.constant 0 : index
      %22 = vector.load %arg4[%c0_9, %c0_10] : memref<8x2xf32, #tpu.memory_space<vmem>>, vector<8x2xf32>
      tpu.vector_store %arg4[%c0_9, %c0_10], %21 {strides = array<i32>} : memref<8x2xf32, #tpu.memory_space<vmem>>, vector<8x2xf32>,
    } else {
    }
    %cst_3 = arith.constant 5.000000e-01 : f32
    %9 = arith.cmpf ole, %2, %cst_3 : f32
    %10 = arith.extui %9 : i1 to i32
    %c0_i32_4 = arith.constant 0 : i32
    %11 = arith.cmpi ne, %10, %c0_i32_4 : i32
    scf.if %11 {
      %12 = math.log %5 : vector<8x200xf32>
      %13 = vector.broadcast %0 : f32 to vector<8x200xf32>
      %14 = arith.mulf %13, %12 : vector<8x200xf32>
      %15 = math.exp %14 : vector<8x200xf32>
      %c0_5 = arith.constant 0 : index
      %c0_6 = arith.constant 0 : index
      %16 = vector.load %arg3[%c0_5, %c0_6] : memref<200x2xf32, #tpu.memory_space<vmem>>, vector<200x2xf32>
      %cst_7 = arith.constant dense<0.000000e+00> : vector<8x2xf32>
      %17 = tpu.matmul %15, %16, %cst_7 {dimension_numbers = #tpu.dot_dimension_numbers<[1], [0], [0], [1], [0, 0, 1, 1], [], []>, precision = #tpu.contract_precision<fp32>} : vector<8x200xf32>, vector<200x2xf32>, vector<8x2xf32> -> vector<8x2xf32>
      %cst_8 = arith.constant 0.00999999977 : f32
      %18 = vector.broadcast %cst_8 : f32 to vector<8x2xf32>
      %19 = arith.mulf %17, %18 : vector<8x2xf32>
      %20 = math.log %19 : vector<8x2xf32>
      %21 = vector.broadcast %1 : f32 to vector<8x2xf32>
      %22 = arith.mulf %20, %21 : vector<8x2xf32>
      %23 = math.exp %22 : vector<8x2xf32>
      %c0_9 = arith.constant 0 : index
      %c0_10 = arith.constant 0 : index
      %24 = vector.load %arg4[%c0_9, %c0_10] : memref<8x2xf32, #tpu.memory_space<vmem>>, vector<8x2xf32>
      tpu.vector_store %arg4[%c0_9, %c0_10], %23 {strides = array<i32>} : memref<8x2xf32, #tpu.memory_space<vmem>>, vector<8x2xf32>,
    } else {
    }
    return
  }
  func.func @transform_0(%arg0: i32) -> i32 {
    %c0_i32 = arith.constant 0 : i32
    %c0_i32_0 = arith.constant 0 : i32
    return %c0_i32 : i32
  }
  func.func @transform_1(%arg0: i32) -> (i32, i32) {
    %c0_i32 = arith.constant 0 : i32
    %c0_i32_0 = arith.constant 0 : i32
    return %arg0, %c0_i32 : i32, i32
  }
  func.func @transform_2(%arg0: i32) -> (i32, i32) {
    %c0_i32 = arith.constant 0 : i32
    %c0_i32_0 = arith.constant 0 : i32
    %c0_i32_1 = arith.constant 0 : i32
    return %c0_i32, %c0_i32_0 : i32, i32
  }
  func.func @transform_3(%arg0: i32) -> (i32, i32) {
    %c0_i32 = arith.constant 0 : i32
    %c0_i32_0 = arith.constant 0 : i32
    return %arg0, %c0_i32 : i32, i32
  }
}

</mosaic_0001>

<bundles_post_ra>
// kernel: tpu_custom_call.1
= control target key start
LH: loop header
LB: loop body
LE: loop exit
PB: predicated region body
PF: predicated region fallthrough
CT: control target
= control target key end

     0   :  { %8 = vsyncpa [#allocation3], 0  ;;  %s2452_s12 = smov 0   ;;  %s3634_s0 = inlined_call_operand.vmem [shape: f32[3], index: 0, kind: input, shape index: {}]   ;;  %s3635_s1 = inlined_call_operand.vmem [shape: f32[16,200], index: 1, kind: input, shape index: {}]   ;;  %s3636_s2 = inlined_call_operand.vmem [shape: f32[200,2], index: 2, kind: input, shape index: {}]   ;;  %s3637_s3 = inlined_call_operand.vmem [shape: f32[16,2], index: 3, kind: output, shape index: {}]  }
   0x1 LB: > { %s1896_s13 = sadd.s32 4294967295, %s2425_s12   ;;  %p1898_p0 = scmp.ge.s32.totalorder %s2425_s12, 1  ;;  %s2425_s12 = sphi %s2452_s12, %s14_s12  }
   0x2   : > { %p113_p1 = scmp.lt.s32.totalorder %s2425_s12, 3  ;;  %s126_s16 = sshll.u32 %s3634_s0, 4  ;;  %s127_s16 = int_to_ptr.vmem [resolvable:$true] %s126_s16 }
   0x3   : > { %p2369_p3 = scmp.eq.s32.totalorder %s1896_s13, 0  ;;  %s2400_s18 = scalar_lea.vmem %s127_s16, 16 }
   0x4   : > { %p2463_p2 = pnand %p1898_p0, %p113_p1  ;;  %p2401_p6 = scmp.ne.s32.totalorder %s127_s16, %s2400_s18 }
   0x5   : > { %p2408_p10 = scmp.lt.s32.totalorder %s127_s16, %s127_s16  ;;  %p2409_p11 = scmp.lt.s32.totalorder %s2400_s18, %s2400_s18 }
   0x6   : > { %p2365_p4 = pneg %p2463_p2 }
   0x7   : > { %p2410_p12 = por %p2409_p11, %p2408_p10 }
   0x8   : > { %p2366_p5 = pnand %p2369_p3, %p2365_p4 }
   0xa   : > { %p2402_p7 = pneg %p2366_p5 }
   0xc   : > { %p2403_p8 = pnand %p2402_p7, %p2401_p6 }
   0xe   : > { %p2404_p9 = pneg %p2403_p8 }
  0x10   : > { %p2411_p13 = pnand %p2410_p12, %p2404_p9 }
  0x12   : > { %2414 = shalt.err (!%p2411_p13)
}
  0x13   : > { %s2427_s19 = smov [#allocation2]   ;;  %150 = sbr.rel (%p2463_p2) target bundleno = 856 (0x358), region = 32 }
  0x14   : > { %2368 = dma.vmem_to_smem (!%p2366_p5), %s127_s16, 16, %s2427_s19, [#allocation3]  }
  0x1a   : > { %2420 = dma.done.wait (%p2369_p3), [#allocation3], 16  }
  0x1b   : > { %2422 = vsyncadd (%p2369_p3), [#allocation3], 4294967280 }
  0x1c   : > { %156 = sfence }
  0x1d   : > { %p174_p0 = scmp.lt.s32.totalorder %s1896_s13, 1  ;;  %s2474_s20 = sld [smem:[#allocation2]] }
  0x1e   : > { %s2476_s21 = sld [smem:[#allocation2 + $0x1]]  ;;  %s2478_s22 = sld [smem:[#allocation2 + $0x2]] }
  0x1f   : > { %s3728_s13 = smov (!%p174_p0, %s1896_s13), 1 }
  0x20   : > { %s1910_s23 = sshll.u32 %s3728_s13, 4  ;;  %s1905_s24 = sshll.u32 %s3728_s13, 3 }
  0x21   : > { %s178_s27 = scalar_lea.vmem %s3635_s1, %s1910_s23  ;;  %s2486_s30 = scalar_lea.vmem %s3637_s3, %s1905_s24 }
  0x22   : > { %v186_v0 = vld [vmem:[%s178_s27] sm:$0xff]  ;;  %v187_v1 = vld [vmem:[%s178_s27 + $0x8] sm:$0xff] }
  0x23   : > { %v2488_v2 = vmax.f32 %v186_v0, 1e-06  ;;  %v2490_v3 = vmax.f32 %v187_v1, 1e-06 }
  0x24   : > { %p190_p1 = scmp.gt.f32.partialorder %s2478_s22, 0.5 }
  0x25   : > { %3682 = vst [vmem:[#allocation5_spill] sm:$0xff] %v2488_v2  ;;  %3683 = vst [vmem:[#allocation6_spill] sm:$0xff] %v2490_v3 }
  0x26   : > { %193 = sbr.rel (!%p190_p1) target bundleno = 446 (0x1be), region = 40 }
  0x2d   : > { %v2496_v4 = vld [vmem:[%s3636_s2] sm:$0xff]  ;;  %v2501_v5 = vld [vmem:[%s3636_s2 + $0x8] sm:$0xff]  ;;  %v2506_v6 = vld [vmem:[%s3636_s2 + $0x10] sm:$0xff]  ;;  %v3650_v7 = vmov 0.0|0.0   ;;  %v195_v21 = vmul.f32 %v2490_v3, %v2490_v3  ;;  %vm223_vm0 = vcmask 588800   ;;  %v194_v54 = vmul.f32 %v2488_v2, %v2488_v2 }
  0x2e   : > { %1911 = vmatprep.subr.bf16.mxu1 %v3650_v7  ;;  %2019 = vmatprep.subr.bf16.mxu0 %v3650_v7  ;;  %v228_v8 = vand.u32 4294901760, %v2496_v4  ;;  %v231_v9 = vand.u32 4294901760, %v2501_v5  ;;  %v2515_v10 = vld [vmem:[%s3636_s2 + $0x18] sm:$0xff]  ;;  %v234_v11 = vand.u32 4294901760, %v2506_v6  ;;  %v2522_v13 = vld [vmem:[%s3636_s2 + $0x20] sm:$0xff]  ;;  %v2527_v14 = vld [vmem:[%s3636_s2 + $0x28] sm:$0xff] }
  0x2f   : > { %v237_v12 = vand.u32 4294901760, %v2515_v10  ;;  %v240_v17 = vand.u32 4294901760, %v2522_v13  ;;  %v243_v18 = vand.u32 4294901760, %v2527_v14  ;;  %v2550_v19 = vld [vmem:[%s3636_s2 + $0x30] sm:$0xff]  ;;  %v2555_v20 = vld [vmem:[%s3636_s2 + $0x38] sm:$0xff]  ;;  %v2574_v25 = vld [vmem:[%s3636_s2 + $0x40] sm:$0xff]  ;;  %v197_v27 = vmul.f32 %v195_v21, %v2490_v3 }
  0x30   : > { %v2533_v15 = vpack.c.bf16 %v231_v9, %v228_v8  ;;  %v246_v23 = vand.u32 4294901760, %v2550_v19  ;;  %v249_v24 = vand.u32 4294901760, %v2555_v20  ;;  %v2579_v26 = vld [vmem:[%s3636_s2 + $0x48] sm:$0xff]  ;;  %v252_v29 = vand.u32 4294901760, %v2574_v25  ;;  %v2597_v31 = vld [vmem:[%s3636_s2 + $0x50] sm:$0xff]  ;;  %v2602_v32 = vld [vmem:[%s3636_s2 + $0x58] sm:$0xff] }
  0x31   : > { %v2541_v16 = vpack.c.bf16 %v237_v12, %v234_v11  ;;  %v2565_v22 = vpack.c.bf16 %v243_v18, %v240_v17  ;;  %v3654_v30 = vand.u32 4294901760, %v2579_v26  ;;  %v225_v33 = vsel %vm223_vm0, %v197_v27, 0  ;;  %v2621_v38 = vld [vmem:[%s3636_s2 + $0x60] sm:$0xff]  ;;  %v2626_v39 = vld [vmem:[%s3636_s2 + $0x68] sm:$0xff]  ;;  %v2647_v45 = vld [vmem:[%s3636_s2 + $0x70] sm:$0xff] }
  0x32   : > { %1913 = vmatpush1.bf16.msra.mxu1 %v2533_v15  ;;  %2021 = vmatpush1.bf16.msra.mxu0 %v2533_v15  ;;  %v2588_v28 = vpack.c.bf16 %v249_v24, %v246_v23  ;;  %v3653_v35 = vand.u32 4294901760, %v2597_v31  ;;  %v3652_v36 = vand.u32 4294901760, %v2602_v32  ;;  %v2614_v37 = vand.u32 4294901760, %v225_v33  ;;  %v2652_v46 = vld [vmem:[%s3636_s2 + $0x78] sm:$0xff]  ;;  %v2670_v52 = vld [vmem:[%s3636_s2 + $0x80] sm:$0xff]  ;;  %v2675_v53 = vld [vmem:[%s3636_s2 + $0x88] sm:$0xff] }
  0x33   : > { %1914 = vmatprep.subr.bf16.mxu1 %v3650_v7  ;;  %2022 = vmatprep.subr.bf16.mxu0 %v3650_v7  ;;  %v2610_v34 = vpack.c.bf16 %v3654_v30, %v252_v29  ;;  %v3649_v42 = vand.u32 4294901760, %v2621_v38  ;;  %v3646_v43 = vand.u32 4294901760, %v2626_v39  ;;  %v3645_v49 = vand.u32 4294901760, %v2647_v45  ;;  %v2694_v58 = vld [vmem:[%s3636_s2 + $0x90] sm:$0xff]  ;;  %v2699_v59 = vld [vmem:[%s3636_s2 + $0x98] sm:$0xff]  ;;  %v2717_v0 = vld [vmem:[%s3636_s2 + $0xa0] sm:$0xff] }
  0x34   : > { %v2629_v40 = vsub.f32 %v225_v33, %v2614_v37  ;;  %v2637_v41 = vpack.c.bf16 %v3652_v36, %v3653_v35  ;;  %v3644_v50 = vand.u32 4294901760, %v2652_v46  ;;  %v3643_v56 = vand.u32 4294901760, %v2670_v52  ;;  %v2722_v1 = vld [vmem:[%s3636_s2 + $0xa8] sm:$0xff] }
  0x35   : > { %v2661_v48 = vpack.c.bf16 %v3646_v43, %v3649_v42  ;;  %v3642_v57 = vand.u32 4294901760, %v2675_v53  ;;  %v196_v60 = vmul.f32 %v194_v54, %v2488_v2  ;;  %v3639_v62 = vand.u32 4294901760, %v2694_v58 }
  0x36   : > { %1916 = vmatpush1.bf16.msra.mxu1 %v2541_v16  ;;  %2024 = vmatpush1.bf16.msra.mxu0 %v2541_v16  ;;  %v318_v44 = vand.u32 4294901760, %v2629_v40  ;;  %v2685_v55 = vpack.c.bf16 %v3644_v50, %v3645_v49  ;;  %v3638_v63 = vand.u32 4294901760, %v2699_v59  ;;  %v2729_v27 = vsub.f32 %v2496_v4, %v228_v8 }
  0x37   : > { %1917 = vmatprep.subr.bf16.mxu1 %v3650_v7  ;;  %2025 = vmatprep.subr.bf16.mxu0 %v3650_v7  ;;  %v2708_v61 = vpack.c.bf16 %v3642_v57, %v3643_v56  ;;  %v2724_v21 = vand.u32 4294901760, %v196_v60  ;;  %v2734_v33 = vsub.f32 %v2501_v5, %v231_v9  ;;  %v3640_v4 = vand.u32 4294901760, %v2722_v1  ;;  %v2756_v5 = vld [vmem:[%s3636_s2 + $0xb0] sm:$0xff]  ;;  %v2761_v9 = vld [vmem:[%s3636_s2 + $0xb8] sm:$0xff] }
  0x38   : > { %v319_v47 = vsub.f32 %v2629_v40, %v318_v44  ;;  %745 = vmatprep.mubr.f32.mxu0 %v318_v44  ;;  %v2742_v44 = vpack.c.bf16 %v3638_v63, %v3639_v62  ;;  %v2749_v8 = vsub.f32 %v2506_v6, %v234_v11  ;;  %v335_v11 = vand.u32 4294901760, %v2729_v27 }
  0x39   : > { %v2769_v6 = vsub.f32 %v196_v60, %v2724_v21  ;;  %v342_v54 = vand.u32 4294901760, %v2734_v33  ;;  %v2789_v62 = vsub.f32 %v2522_v13, %v240_v17  ;;  %v2828_v42 = vsub.f32 %v2555_v20, %v249_v24 }
  0x3a   : > { %1919 = vmatpush1.bf16.msra.mxu1 %v2565_v22  ;;  %2027 = vmatpush1.bf16.msra.mxu0 %v2565_v22  ;;  %v320_v51 = vand.u32 4294901760, %v319_v47  ;;  %v3641_v47 = vand.u32 4294901760, %v2717_v0  ;;  %v349_v60 = vand.u32 4294901760, %v2749_v8  ;;  %v336_v56 = vsub.f32 %v2729_v27, %v335_v11 }
  0x3b   : > { %1920 = vmatprep.subr.bf16.mxu1 %v3650_v7  ;;  %2028 = vmatprep.subr.bf16.mxu0 %v3650_v7  ;;  %3684 = vst [vmem:[#allocation7_spill] sm:$0xff] %v2769_v6  ;;  %v343_v50 = vsub.f32 %v2734_v33, %v342_v54  ;;  %v363_v43 = vand.u32 4294901760, %v2789_v62  ;;  %v2838_v30 = vsub.f32 %v2574_v25, %v252_v29  ;;  %v3659_v20 = vmov 0.0  }
  0x3c   : > { %321 = vmatprep.mubr.f32.mxu1 %v320_v51  ;;  %v2766_v51 = vsub.f32 %v2515_v10, %v237_v12  ;;  %v2779_v63 = vpack.c.bf16 %v3640_v4, %v3641_v47  ;;  %v3648_v10 = vand.u32 4294901760, %v2756_v5  ;;  %v3647_v12 = vand.u32 4294901760, %v2761_v9 }
  0x3d   : > { %v2794_v4 = vsub.f32 %v2527_v14, %v243_v18  ;;  %v324_v47 = vand.u32 4294901760, %v2769_v6  ;;  %v2813_v14 = vld [vmem:[%s3636_s2 + $0xc0] sm:$0xff]  ;;  %v350_v17 = vsub.f32 %v2749_v8, %v349_v60  ;;  %v344_v36 = vand.u32 4294901760, %v343_v50 }
  0x3e   : > { %1922 = vmatpush1.bf16.msra.mxu1 %v2588_v28  ;;  %2030 = vmatpush1.bf16.msra.mxu0 %v2588_v28  ;;  %v356_v57 = vand.u32 4294901760, %v2766_v51  ;;  %v2806_v13 = vpack.c.bf16 %v3647_v12, %v3648_v10  ;;  %v2823_v10 = vsub.f32 %v2550_v19, %v246_v23  ;;  %v2833_v35 = vand.u32 4294901760, %v2813_v14 }
  0x3f   : > { %1923 = vmatprep.subr.bf16.mxu1 %v3650_v7  ;;  %2031 = vmatprep.subr.bf16.mxu0 %v3650_v7  ;;  %v325_v18 = vsub.f32 %v2769_v6, %v324_v47  ;;  %v370_v12 = vand.u32 4294901760, %v2794_v4  ;;  %v3686_v19 = vand.u32 4294901760, %v2579_v26  ;;  %v351_v24 = vand.u32 4294901760, %v350_v17 }
  0x40   : > { %3685 = vst [vmem:[#allocation8_spill] sm:$0xff] %v2806_v13  ;;  %v357_v49 = vsub.f32 %v2766_v51, %v356_v57  ;;  %v364_v3 = vsub.f32 %v2789_v62, %v363_v43  ;;  %v2056_v25 = vpack.c.bf16 %v342_v54, %v335_v11  ;;  %v377_v29 = vand.u32 4294901760, %v2823_v10 }
  0x41   : > { %v2843_v23 = vsub.f32 %v2579_v26, %v3686_v19  ;;  %v326_v50 = vand.u32 4294901760, %v325_v18  ;;  %v371_v2 = vsub.f32 %v2794_v4, %v370_v12  ;;  %v3687_v26 = vand.u32 4294901760, %v2597_v31 }
  0x42   : > { %1925 = vmatpush1.bf16.msra.mxu1 %v2610_v34  ;;  %2033 = vmatpush1.bf16.msra.mxu0 %v2610_v34  ;;  %v2059_v11 = vpack.c.bf16 %v356_v57, %v349_v60  ;;  %v365_v54 = vand.u32 4294901760, %v364_v3  ;;  %v2062_v60 = vpack.c.bf16 %v370_v12, %v363_v43  ;;  %v3693_v12 = vand.u32 4294901760, %v2652_v46 }
  0x43   : > { %1926 = vmatprep.subr.bf16.mxu1 %v3650_v7  ;;  %2034 = vmatprep.subr.bf16.mxu0 %v3650_v7  ;;  %v2856_v17 = vsub.f32 %v2597_v31, %v3687_v26  ;;  %v372_v19 = vand.u32 4294901760, %v371_v2  ;;  %v378_v31 = vsub.f32 %v2823_v10, %v377_v29  ;;  %v3691_v2 = vand.u32 4294901760, %v2626_v39 }
  0x44   : > { %vm1005_vm1 = vcmask 15360  }
  0x45   : > { %v2879_v3 = vsub.f32 %v2626_v39, %v3691_v2  ;;  %v3692_v39 = vand.u32 4294901760, %v2647_v45 }
  0x46   : > { %1928 = vmatpush1.bf16.msra.mxu1 %v2637_v41  ;;  %2036 = vmatpush1.bf16.msra.mxu0 %v2637_v41 }
  0x47   : > { %1929 = vmatprep.subr.bf16.mxu1 %v3650_v7  ;;  %2037 = vmatprep.subr.bf16.mxu0 %v3650_v7  ;;  %v2892_v43 = vsub.f32 %v2647_v45, %v3692_v39 }
  0x4a   : > { %1931 = vmatpush1.bf16.msra.mxu1 %v2661_v48  ;;  %2039 = vmatpush1.bf16.msra.mxu0 %v2661_v48 }
  0x4b   : > { %1932 = vmatprep.subr.bf16.mxu1 %v3650_v7  ;;  %2040 = vmatprep.subr.bf16.mxu0 %v3650_v7 }
  0x4e   : > { %1934 = vmatpush1.bf16.msra.mxu1 %v2685_v55  ;;  %2042 = vmatpush1.bf16.msra.mxu0 %v2685_v55 }
  0x4f   : > { %1935 = vmatprep.subr.bf16.mxu1 %v3650_v7  ;;  %2043 = vmatprep.subr.bf16.mxu0 %v3650_v7 }
  0x52   : > { %1937 = vmatpush1.bf16.msra.mxu1 %v2708_v61  ;;  %2045 = vmatpush1.bf16.msra.mxu0 %v2708_v61 }
  0x53   : > { %1938 = vmatprep.subr.bf16.mxu1 %v3650_v7  ;;  %2046 = vmatprep.subr.bf16.mxu0 %v3650_v7 }
  0x56   : > { %1940 = vmatpush1.bf16.msra.mxu1 %v2742_v44  ;;  %2048 = vmatpush1.bf16.msra.mxu0 %v2742_v44 }
  0x57   : > { %1941 = vmatprep.subr.bf16.mxu1 %v3650_v7  ;;  %2049 = vmatprep.subr.bf16.mxu0 %v3650_v7 }
  0x5a   : > { %1943 = vmatpush1.bf16.msra.mxu1 %v2779_v63  ;;  %2051 = vmatpush1.bf16.msra.mxu0 %v2779_v63 }
  0x5b   : > { %1944 = vmatprep.subr.bf16.mxu1 %v3650_v7  ;;  %2052 = vmatprep.subr.bf16.mxu0 %v3650_v7  ;;  %v337_v7 = vand.u32 4294901760, %v336_v56  ;;  %v358_v56 = vand.u32 4294901760, %v357_v49  ;;  %v3688_v49 = vand.u32 4294901760, %v2602_v32 }
  0x5d   : > { %v1948_v6 = vpack.c.bf16 %v344_v36, %v337_v7  ;;  %v2861_v18 = vsub.f32 %v2602_v32, %v3688_v49  ;;  %v3689_v7 = vmov 0.0|0.0   ;;  %v1951_v36 = vpack.c.bf16 %v358_v56, %v351_v24 }
  0x5e   : > { %1946 = vmatpush1.bf16.msra.mxu1 %v2806_v13  ;;  %2054 = vmatpush1.bf16.msra.mxu0 %v2806_v13  ;;  %v384_v13 = vand.u32 4294901760, %v2828_v42  ;;  %v398_v32 = vand.u32 4294901760, %v2843_v23  ;;  %v405_v24 = vand.u32 4294901760, %v2856_v17  ;;  %v379_v56 = vand.u32 4294901760, %v378_v31 }
  0x5f   : > { %299 = vmatprep.subr.mxu1 %v3659_v20  ;;  %725 = vmatprep.subr.mxu0 %v3659_v20  ;;  %v391_v20 = vand.u32 4294901760, %v2838_v30  ;;  %v426_v31 = vand.u32 4294901760, %v2879_v3 }
  0x60   : > { %v385_v26 = vsub.f32 %v2828_v42, %v384_v13  ;;  %v399_v49 = vsub.f32 %v2843_v23, %v398_v32 }
  0x62   : > { %301 = vmatpush1.msra.mxu1 %v2833_v35  ;;  %727 = vmatpush1.msra.mxu0 %v2833_v35  ;;  %v400_v2 = vand.u32 4294901760, %v399_v49 }
  0x63   : > { %1947 = vmatprep.subr.bf16.mxu1 %v3689_v7  ;;  %2055 = vmatprep.subr.bf16.mxu0 %v3689_v7 }
  0x64   : > { %327 = vmatmul.mubr.f32.vlgmr.msra.gmra.mrb[0].mxu1 %v326_v50  ;;  %749 = vmatmul.mubr.f32.vlgmr.msra.gmra.mrb[0].mxu0 %v324_v47  ;;  %v3690_v47 = vand.u32 4294901760, %v2621_v38  ;;  %v412_v50 = vand.u32 4294901760, %v2861_v18 }
  0x65   : > { %1949 = vmatpush1.bf16.msra.mxu1 %v1948_v6  ;;  %2057 = vmatpush1.bf16.msra.mxu0 %v2056_v25  ;;  %v1954_v6 = vpack.c.bf16 %v372_v19, %v365_v54  ;;  %v392_v25 = vsub.f32 %v2838_v30, %v391_v20  ;;  %v406_v54 = vsub.f32 %v2856_v17, %v405_v24 }
  0x66   : > { %1950 = vmatprep.subr.bf16.mxu1 %v3689_v7  ;;  %2058 = vmatprep.subr.bf16.mxu0 %v3689_v7  ;;  %v2874_v57 = vsub.f32 %v2621_v38, %v3690_v47  ;;  %v386_v38 = vand.u32 4294901760, %v385_v26  ;;  %v413_v45 = vsub.f32 %v2861_v18, %v412_v50 }
  0x67   : > { %522 = vmatprep.mubr.f32.mxu1 %v2614_v37  ;;  %894 = vmatprep.mubr.f32.mxu0 %v2614_v37  ;;  %v393_v47 = vand.u32 4294901760, %v392_v25 }
  0x68   : > { %v419_v19 = vand.u32 4294901760, %v2874_v57  ;;  %v1957_v26 = vpack.c.bf16 %v386_v38, %v379_v56  ;;  %v427_v38 = vsub.f32 %v2879_v3, %v426_v31  ;;  %v414_v49 = vand.u32 4294901760, %v413_v45 }
  0x69   : > { %1952 = vmatpush1.bf16.msra.mxu1 %v1951_v36  ;;  %2060 = vmatpush1.bf16.msra.mxu0 %v2059_v11  ;;  %v2897_v36 = vsub.f32 %v2652_v46, %v3693_v12  ;;  %v2065_v11 = vpack.c.bf16 %v384_v13, %v377_v29  ;;  %v3694_v46 = vand.u32 4294901760, %v2670_v52  ;;  %v3695_v29 = vand.u32 4294901760, %v2675_v53 }
  0x6a   : > { %1953 = vmatprep.subr.bf16.mxu1 %v3689_v7  ;;  %2061 = vmatprep.subr.bf16.mxu0 %v3689_v7  ;;  %v420_v56 = vsub.f32 %v2874_v57, %v419_v19  ;;  %v1960_v25 = vpack.c.bf16 %v400_v2, %v393_v47  ;;  %v433_v12 = vand.u32 4294901760, %v2892_v43 }
  0x6b   : > { %v2908_v13 = vsub.f32 %v2670_v52, %v3694_v46  ;;  %v2913_v39 = vsub.f32 %v2675_v53, %v3695_v29  ;;  %v440_v52 = vand.u32 4294901760, %v2897_v36  ;;  %v3696_v53 = vand.u32 4294901760, %v2694_v58 }
  0x6c   : > { %v428_v46 = vand.u32 4294901760, %v427_v38  ;;  %v434_v29 = vsub.f32 %v2892_v43, %v433_v12 }
  0x6d   : > { %1955 = vmatpush1.bf16.msra.mxu1 %v1954_v6  ;;  %2063 = vmatpush1.bf16.msra.mxu0 %v2062_v60  ;;  %v2068_v6 = vpack.c.bf16 %v398_v32, %v391_v20  ;;  %v407_v60 = vand.u32 4294901760, %v406_v54  ;;  %v2924_v20 = vsub.f32 %v2694_v58, %v3696_v53  ;;  %v3697_v32 = vand.u32 4294901760, %v2699_v59 }
  0x6e   : > { %1956 = vmatprep.subr.bf16.mxu1 %v3689_v7  ;;  %2064 = vmatprep.subr.bf16.mxu0 %v3689_v7  ;;  %v447_v47 = vand.u32 4294901760, %v2908_v13  ;;  %v454_v2 = vand.u32 4294901760, %v2913_v39  ;;  %v441_v58 = vsub.f32 %v2897_v36, %v440_v52  ;;  %v435_v53 = vand.u32 4294901760, %v434_v29 }
  0x6f   : > { %v2929_v54 = vsub.f32 %v2699_v59, %v3697_v32  ;;  %v1963_v45 = vpack.c.bf16 %v414_v49, %v407_v60  ;;  %v3698_v59 = vand.u32 4294901760, %v2717_v0 }
  0x70   : > { %v448_v60 = vsub.f32 %v2908_v13, %v447_v47  ;;  %v455_v38 = vsub.f32 %v2913_v39, %v454_v2  ;;  %v442_v32 = vand.u32 4294901760, %v441_v58 }
  0x71   : > { %1958 = vmatpush1.bf16.msra.mxu1 %v1957_v26  ;;  %2066 = vmatpush1.bf16.msra.mxu0 %v2065_v11  ;;  %v2071_v11 = vpack.c.bf16 %v412_v50, %v405_v24  ;;  %v421_v26 = vand.u32 4294901760, %v420_v56  ;;  %v2940_v24 = vsub.f32 %v2717_v0, %v3698_v59  ;;  %v3699_v50 = vand.u32 4294901760, %v2722_v1 }
  0x72   : > { %1959 = vmatprep.subr.bf16.mxu1 %v3689_v7  ;;  %2067 = vmatprep.subr.bf16.mxu0 %v3689_v7  ;;  %v468_v0 = vand.u32 4294901760, %v2929_v54  ;;  %v1969_v29 = vpack.c.bf16 %v442_v32, %v435_v53  ;;  %v2977_v53 = vsub.f32 %v2813_v14, %v2833_v35 }
  0x73   : > { %v2945_v56 = vsub.f32 %v2722_v1, %v3699_v50  ;;  %v1966_v49 = vpack.c.bf16 %v428_v46, %v421_v26  ;;  %v3700_v1 = vand.u32 4294901760, %v2756_v5  ;;  %v449_v26 = vand.u32 4294901760, %v448_v60 }
  0x74   : > { %v469_v58 = vsub.f32 %v2929_v54, %v468_v0  ;;  %v475_v50 = vand.u32 4294901760, %v2940_v24 }
  0x75   : > { %1961 = vmatpush1.bf16.msra.mxu1 %v1960_v25  ;;  %2069 = vmatpush1.bf16.msra.mxu0 %v2068_v6  ;;  %v2074_v6 = vpack.c.bf16 %v426_v31, %v419_v19  ;;  %v461_v25 = vand.u32 4294901760, %v2924_v20  ;;  %v2956_v19 = vsub.f32 %v2756_v5, %v3700_v1  ;;  %v3701_v31 = vand.u32 4294901760, %v2761_v9 }
  0x76   : > { %1962 = vmatprep.subr.bf16.mxu1 %v3689_v7  ;;  %2070 = vmatprep.subr.bf16.mxu0 %v3689_v7  ;;  %v482_v5 = vand.u32 4294901760, %v2945_v56  ;;  %v2080_v1 = vpack.c.bf16 %v454_v2, %v447_v47  ;;  %v470_v60 = vand.u32 4294901760, %v469_v58 }
  0x77   : > { %v2961_v59 = vsub.f32 %v2761_v9, %v3701_v31  ;;  %v462_v46 = vsub.f32 %v2924_v20, %v461_v25  ;;  %v2083_v47 = vpack.c.bf16 %v468_v0, %v461_v25  ;;  %v503_v25 = vand.u32 4294901760, %v2977_v53 }
  0x79   : > { %1964 = vmatpush1.bf16.msra.mxu1 %v1963_v45  ;;  %2072 = vmatpush1.bf16.msra.mxu0 %v2071_v11  ;;  %v2077_v11 = vpack.c.bf16 %v440_v52, %v433_v12  ;;  %v456_v45 = vand.u32 4294901760, %v455_v38  ;;  %v463_v12 = vand.u32 4294901760, %v462_v46  ;;  %v489_v52 = vand.u32 4294901760, %v2956_v19 }
  0x7a   : > { %1965 = vmatprep.subr.bf16.mxu1 %v3689_v7  ;;  %2073 = vmatprep.subr.bf16.mxu0 %v3689_v7  ;;  %v483_v38 = vsub.f32 %v2945_v56, %v482_v5 }
  0x7b   : > { %v1972_v9 = vpack.c.bf16 %v456_v45, %v449_v26  ;;  %v490_v2 = vsub.f32 %v2956_v19, %v489_v52  ;;  %v1975_v32 = vpack.c.bf16 %v470_v60, %v463_v12  ;;  %v2086_v45 = vpack.c.bf16 %v482_v5, %v475_v50 }
  0x7c   : > { %v3702_v5 = vmov 0.0   ;;  %v1987_v12 = vpack.c.bf16 %v2766_v51, %v2749_v8  ;;  %v1001_v8 = vstv %s2476_s21 }
  0x7d   : > { %1967 = vmatpush1.bf16.msra.mxu1 %v1966_v49  ;;  %2075 = vmatpush1.bf16.msra.mxu0 %v2074_v6  ;;  %v476_v6 = vsub.f32 %v2940_v24, %v475_v50  ;;  %v496_v49 = vand.u32 4294901760, %v2961_v59  ;;  %v491_v14 = vand.u32 4294901760, %v490_v2 }
  0x7e   : > { %1968 = vmatprep.subr.bf16.mxu1 %v3689_v7  ;;  %2076 = vmatprep.subr.bf16.mxu0 %v3689_v7 }
  0x7f   : > { %v477_v31 = vand.u32 4294901760, %v476_v6  ;;  %v497_v26 = vsub.f32 %v2961_v59, %v496_v49  ;;  %v2089_v58 = vpack.c.bf16 %v496_v49, %v489_v52 }
  0x81   : > { %1970 = vmatpush1.bf16.msra.mxu1 %v1969_v29  ;;  %2078 = vmatpush1.bf16.msra.mxu0 %v2077_v11  ;;  %v484_v11 = vand.u32 4294901760, %v483_v38  ;;  %v498_v29 = vand.u32 4294901760, %v497_v26 }
  0x82   : > { %1971 = vmatprep.subr.bf16.mxu1 %v3689_v7  ;;  %2079 = vmatprep.subr.bf16.mxu0 %v3689_v7 }
  0x83   : > { %v1978_v46 = vpack.c.bf16 %v484_v11, %v477_v31  ;;  %v1981_v0 = vpack.c.bf16 %v498_v29, %v491_v14 }
  0x85   : > { %1973 = vmatpush1.bf16.msra.mxu1 %v1972_v9  ;;  %2081 = vmatpush1.bf16.msra.mxu0 %v2080_v1  ;;  %v504_v9 = vsub.f32 %v2977_v53, %v503_v25  ;;  %v1984_v1 = vpack.c.bf16 %v2734_v33, %v2729_v27  ;;  %v1990_v27 = vpack.c.bf16 %v2794_v4, %v2789_v62 }
  0x86   : > { %1974 = vmatprep.subr.bf16.mxu1 %v3689_v7  ;;  %2082 = vmatprep.subr.bf16.mxu0 %v3689_v7 }
  0x87   : > { %v505_v50 = vand.u32 4294901760, %v504_v9 }
  0x89   : > { %1976 = vmatpush1.bf16.msra.mxu1 %v1975_v32  ;;  %2084 = vmatpush1.bf16.msra.mxu0 %v2083_v47 }
  0x8a   : > { %1977 = vmatprep.subr.bf16.mxu1 %v3689_v7  ;;  %2085 = vmatprep.subr.bf16.mxu0 %v3689_v7 }
  0x8d   : > { %1979 = vmatpush1.bf16.msra.mxu1 %v1978_v46  ;;  %2087 = vmatpush1.bf16.msra.mxu0 %v2086_v45 }
  0x8e   : > { %1980 = vmatprep.subr.bf16.mxu1 %v3689_v7  ;;  %2088 = vmatprep.subr.bf16.mxu0 %v3689_v7 }
  0x91   : > { %1982 = vmatpush1.bf16.msra.mxu1 %v1981_v0  ;;  %2090 = vmatpush1.bf16.msra.mxu0 %v2089_v58 }
  0x92   : > { %500 = vmatprep.subr.mxu1 %v3702_v5  ;;  %874 = vmatprep.subr.mxu0 %v3702_v5 }
  0x95   : > { %506 = vmatpush1.msra.mxu1 %v505_v50  ;;  %878 = vmatpush1.msra.mxu0 %v503_v25 }
  0x96   : > { %1983 = vmatprep.subr.bf16.mxu1 %v3689_v7  ;;  %2091 = vmatprep.subr.bf16.mxu0 %v3689_v7 }
  0x97   : > { %524 = vmatmul.mubr.f32.vlgmr.msra.gmra.mrb[0].mxu1 %v2724_v21  ;;  %896 = vmatmul.mubr.f32.vlgmr.msra.gmra.mrb[0].mxu0 %v2724_v21 }
  0x98   : > { %1985 = vmatpush1.bf16.msra.mxu1 %v1984_v1  ;;  %2093 = vmatpush1.bf16.msra.mxu0 %v2533_v15  ;;  %v1993_v15 = vpack.c.bf16 %v2828_v42, %v2823_v10  ;;  %v3703_v42 = vld [vmem:[#allocation8_spill] sm:$0xff] }
  0x99   : > { %1986 = vmatprep.subr.bf16.mxu1 %v3689_v7  ;;  %2094 = vmatprep.subr.bf16.mxu0 %v3689_v7 }
  0x9a   : > { %645 = vmatprep.mubr.f32.mxu1 %v2629_v40  ;;  %991 = vmatprep.mubr.f32.mxu0 %v2614_v37  ;;  %v2011_v37 = vpack.c.bf16 %v2929_v54, %v2924_v20  ;;  %v2014_v40 = vpack.c.bf16 %v2945_v56, %v2940_v24 }
  0x9c   : > { %1988 = vmatpush1.bf16.msra.mxu1 %v1987_v12  ;;  %2096 = vmatpush1.bf16.msra.mxu0 %v2541_v16  ;;  %v1996_v16 = vpack.c.bf16 %v2843_v23, %v2838_v30  ;;  %v2005_v30 = vpack.c.bf16 %v2897_v36, %v2892_v43 }
  0x9d   : > { %1989 = vmatprep.subr.bf16.mxu1 %v3689_v7  ;;  %2097 = vmatprep.subr.bf16.mxu0 %v3689_v7 }
  0xa0   : > { %1991 = vmatpush1.bf16.msra.mxu1 %v1990_v27  ;;  %2099 = vmatpush1.bf16.msra.mxu0 %v2565_v22  ;;  %v1999_v22 = vpack.c.bf16 %v2861_v18, %v2856_v17 }
  0xa1   : > { %1992 = vmatprep.subr.bf16.mxu1 %v3689_v7  ;;  %2100 = vmatprep.subr.bf16.mxu0 %v3689_v7 }
  0xa4   : > { %1994 = vmatpush1.bf16.msra.mxu1 %v1993_v15  ;;  %2102 = vmatpush1.bf16.msra.mxu0 %v2588_v28  ;;  %v2002_v28 = vpack.c.bf16 %v2879_v3, %v2874_v57 }
  0xa5   : > { %1995 = vmatprep.subr.bf16.mxu1 %v3689_v7  ;;  %2103 = vmatprep.subr.bf16.mxu0 %v3689_v7 }
  0xa8   : > { %1997 = vmatpush1.bf16.msra.mxu1 %v1996_v16  ;;  %2105 = vmatpush1.bf16.msra.mxu0 %v2610_v34  ;;  %v2008_v34 = vpack.c.bf16 %v2913_v39, %v2908_v13 }
  0xa9   : > { %1998 = vmatprep.subr.bf16.mxu1 %v3689_v7  ;;  %2106 = vmatprep.subr.bf16.mxu0 %v3689_v7 }
  0xac   : > { %2000 = vmatpush1.bf16.msra.mxu1 %v1999_v22  ;;  %2108 = vmatpush1.bf16.msra.mxu0 %v2637_v41  ;;  %v2017_v41 = vpack.c.bf16 %v2961_v59, %v2956_v19 }
  0xad   : > { %2001 = vmatprep.subr.bf16.mxu1 %v3689_v7  ;;  %2109 = vmatprep.subr.bf16.mxu0 %v3689_v7 }
  0xb0   : > { %2003 = vmatpush1.bf16.msra.mxu1 %v2002_v28  ;;  %2111 = vmatpush1.bf16.msra.mxu0 %v2661_v48  ;;  %v3704_v48 = vld [vmem:[#allocation7_spill] sm:$0xff] }
  0xb1   : > { %2004 = vmatprep.subr.bf16.mxu1 %v3689_v7  ;;  %2112 = vmatprep.subr.bf16.mxu0 %v3689_v7 }
  0xb4   : > { %2006 = vmatpush1.bf16.msra.mxu1 %v2005_v30  ;;  %2114 = vmatpush1.bf16.msra.mxu0 %v2685_v55 }
  0xb5   : > { %2007 = vmatprep.subr.bf16.mxu1 %v3689_v7  ;;  %2115 = vmatprep.subr.bf16.mxu0 %v3689_v7 }
  0xb8   : > { %2009 = vmatpush1.bf16.msra.mxu1 %v2008_v34  ;;  %2117 = vmatpush1.bf16.msra.mxu0 %v2708_v61 }
  0xb9   : > { %2010 = vmatprep.subr.bf16.mxu1 %v3689_v7  ;;  %2118 = vmatprep.subr.bf16.mxu0 %v3689_v7 }
  0xbc   : > { %2012 = vmatpush1.bf16.msra.mxu1 %v2011_v37  ;;  %2120 = vmatpush1.bf16.msra.mxu0 %v2742_v44 }
  0xbd   : > { %2013 = vmatprep.subr.bf16.mxu1 %v3689_v7  ;;  %2121 = vmatprep.subr.bf16.mxu0 %v3689_v7 }
  0xc0   : > { %2015 = vmatpush1.bf16.msra.mxu1 %v2014_v40  ;;  %2123 = vmatpush1.bf16.msra.mxu0 %v2779_v63 }
  0xc1   : > { %2016 = vmatprep.subr.bf16.mxu1 %v3689_v7  ;;  %2124 = vmatprep.subr.bf16.mxu0 %v3689_v7 }
  0xc4   : > { %2018 = vmatpush1.bf16.msra.mxu1 %v2017_v41  ;;  %2126 = vmatpush1.bf16.msra.mxu0 %v3703_v42 }
  0xc5   : > { %625 = vmatprep.subr.mxu1 %v3702_v5  ;;  %973 = vmatprep.subr.mxu0 %v3702_v5 }
  0xc8   : > { %628 = vmatpush1.msra.mxu1 %v2977_v53  ;;  %975 = vmatpush1.msra.mxu0 %v2833_v35 }
  0xc9   : > { %648 = vmatmul.mubr.f32.vlgmr.msra.gmra.mrb[0].mxu1 %v3704_v48  ;;  %993 = vmatmul.mubr.f32.vlgmr.msra.gmra.mrb[0].mxu0 %v2724_v21 }
 0x19c   : > { %v649_v55 = vpop.f32.mrb[0].mxu1  ;;  %v994_v61 = vpop.f32.mrb[0].mxu0 }
 0x19d   : > { %v2343_v62 = vadd.f32 %v994_v61, %v649_v55  ;;  %v651_v63 = vpop.f32.mrb[1].mxu1  ;;  %v996_v33 = vpop.f32.mrb[1].mxu0 }
 0x19f   : > { %v998_v44 = vmul.f32 0.01, %v2343_v62 }
 0x1a1   : > { %2384 = vlog2.f32 %v998_v44 }
 0x1ab   : > { %v2385_v4 = vpop.eup %2384 }
 0x1ac   : > { %v1000_v51 = vmul.f32 0.6931472, %v2385_v4 }
 0x1ae   : > { %v1002_v10 = vmul.f32 %v1001_v8, %v1000_v51 }
 0x1b0   : > { %v1003_v23 = vmul.f32 1.442695, %v1002_v10 }
 0x1b2   : > { %2386 = vpow2.f32 %v1003_v23 }
 0x1bc   : > { %v2387_v35 = vpop.eup %2386 }
 0x1bd   : > { %1006 = vst.msk [vmem:[%s2486_s30] sm:$0xff] %vm1005_vm1, %v2387_v35 }
 0x1be PF: > { %p1007_p2 = scmp.le.f32.partialorder %s2478_s22, 0.5 }
 0x1c0   : > { %1010 = sbr.rel (!%p1007_p2) target bundleno = 856 (0x358), region = 44 }
 0x1c7   : > { %v3067_v21 = vld [vmem:[%s3636_s2] sm:$0xff]  ;;  %v3072_v17 = vld [vmem:[%s3636_s2 + $0x8] sm:$0xff]  ;;  %v3077_v18 = vld [vmem:[%s3636_s2 + $0x10] sm:$0xff]  ;;  %v3673_v7 = vmov 0.0|0.0   ;;  %v1015_v0 = vstv %s2474_s20  ;;  %vm1047_vm2 = vcmask 588800   ;;  %vm1829_vm3 = vcmask 15360  }
 0x1c8   : > { %2127 = vmatprep.subr.bf16.mxu1 %v3673_v7  ;;  %2235 = vmatprep.subr.bf16.mxu0 %v3673_v7  ;;  %v1052_v57 = vand.u32 4294901760, %v3067_v21  ;;  %v1055_v3 = vand.u32 4294901760, %v3072_v17  ;;  %v3086_v43 = vld [vmem:[%s3636_s2 + $0x18] sm:$0xff]  ;;  %v1058_v36 = vand.u32 4294901760, %v3077_v18  ;;  %v3705_v13 = vld [vmem:[#allocation5_spill] sm:$0xff]  ;;  %v3099_v54 = vld [vmem:[%s3636_s2 + $0x28] sm:$0xff] }
 0x1c9   : > { %2388 = vlog2.f32 %v3705_v13  ;;  %v1061_v39 = vand.u32 4294901760, %v3086_v43  ;;  %v3094_v20 = vld [vmem:[%s3636_s2 + $0x20] sm:$0xff]  ;;  %v3706_v24 = vld [vmem:[#allocation6_spill] sm:$0xff]  ;;  %v1067_v52 = vand.u32 4294901760, %v3099_v54  ;;  %v3123_v60 = vld [vmem:[%s3636_s2 + $0x30] sm:$0xff] }
 0x1ca   : > { %2390 = vlog2.f32 %v3706_v24  ;;  %v3106_v56 = vpack.c.bf16 %v1055_v3, %v1052_v57  ;;  %v1064_v59 = vand.u32 4294901760, %v3094_v20  ;;  %v3128_v6 = vld [vmem:[%s3636_s2 + $0x38] sm:$0xff]  ;;  %v1070_v49 = vand.u32 4294901760, %v3123_v60  ;;  %v3145_v47 = vld [vmem:[%s3636_s2 + $0x40] sm:$0xff]  ;;  %v3150_v2 = vld [vmem:[%s3636_s2 + $0x48] sm:$0xff] }
 0x1cb   : > { %v3114_v19 = vpack.c.bf16 %v1061_v39, %v1058_v36  ;;  %v1073_v53 = vand.u32 4294901760, %v3128_v6  ;;  %v1076_v26 = vand.u32 4294901760, %v3145_v47  ;;  %v1079_v45 = vand.u32 4294901760, %v3150_v2  ;;  %v3167_v46 = vld [vmem:[%s3636_s2 + $0x50] sm:$0xff]  ;;  %v3172_v14 = vld [vmem:[%s3636_s2 + $0x58] sm:$0xff]  ;;  %v3190_v1 = vld [vmem:[%s3636_s2 + $0x60] sm:$0xff] }
 0x1cc   : > { %2129 = vmatpush1.bf16.msra.mxu1 %v3106_v56  ;;  %2237 = vmatpush1.bf16.msra.mxu0 %v3106_v56  ;;  %v3136_v38 = vpack.c.bf16 %v1067_v52, %v1064_v59  ;;  %v3676_v9 = vand.u32 4294901760, %v3167_v46  ;;  %v3675_v50 = vand.u32 4294901760, %v3172_v14  ;;  %v3195_v12 = vld [vmem:[%s3636_s2 + $0x68] sm:$0xff]  ;;  %v3672_v28 = vand.u32 4294901760, %v3190_v1  ;;  %v3212_v34 = vld [vmem:[%s3636_s2 + $0x70] sm:$0xff]  ;;  %v3217_v37 = vld [vmem:[%s3636_s2 + $0x78] sm:$0xff] }
 0x1cd   : > { %2130 = vmatprep.subr.bf16.mxu1 %v3673_v7  ;;  %2238 = vmatprep.subr.bf16.mxu0 %v3673_v7  ;;  %v3158_v11 = vpack.c.bf16 %v1073_v53, %v1070_v49  ;;  %v3181_v58 = vpack.c.bf16 %v1079_v45, %v1076_v26  ;;  %v3671_v30 = vand.u32 4294901760, %v3195_v12  ;;  %v3670_v41 = vand.u32 4294901760, %v3212_v34  ;;  %v3234_v48 = vld [vmem:[%s3636_s2 + $0x80] sm:$0xff]  ;;  %v3239_v55 = vld [vmem:[%s3636_s2 + $0x88] sm:$0xff]  ;;  %v3256_v33 = vld [vmem:[%s3636_s2 + $0x90] sm:$0xff] }
 0x1ce   : > { %v3203_v22 = vpack.c.bf16 %v3675_v50, %v3676_v9  ;;  %v3669_v42 = vand.u32 4294901760, %v3217_v37  ;;  %v3666_v62 = vand.u32 4294901760, %v3234_v48  ;;  %v3665_v63 = vand.u32 4294901760, %v3239_v55  ;;  %v3261_v44 = vld [vmem:[%s3636_s2 + $0x98] sm:$0xff]  ;;  %v3278_v13 = vld [vmem:[%s3636_s2 + $0xa0] sm:$0xff]  ;;  %v3283_v24 = vld [vmem:[%s3636_s2 + $0xa8] sm:$0xff] }
 0x1cf   : > { %v3225_v40 = vpack.c.bf16 %v3671_v30, %v3672_v28  ;;  %v3662_v10 = vand.u32 4294901760, %v3256_v33  ;;  %v3661_v23 = vand.u32 4294901760, %v3261_v44  ;;  %v3406_v28 = vsub.f32 %v3145_v47, %v1076_v26 }
 0x1d0   : > { %2132 = vmatpush1.bf16.msra.mxu1 %v3114_v19  ;;  %2240 = vmatpush1.bf16.msra.mxu0 %v3114_v19  ;;  %v3247_v61 = vpack.c.bf16 %v3669_v42, %v3670_v41  ;;  %v3269_v51 = vpack.c.bf16 %v3665_v63, %v3666_v62 }
 0x1d1   : > { %2133 = vmatprep.subr.bf16.mxu1 %v3673_v7  ;;  %2241 = vmatprep.subr.bf16.mxu0 %v3673_v7 }
 0x1d3   : > { %v2389_v32 = vpop.eup %2388 }
 0x1d4   : > { %v2391_v31 = vpop.eup %2390  ;;  %2135 = vmatpush1.bf16.msra.mxu1 %v3136_v38  ;;  %2243 = vmatpush1.bf16.msra.mxu0 %v3136_v38  ;;  %v1012_v29 = vmul.f32 0.6931472, %v2389_v32 }
 0x1d5   : > { %2136 = vmatprep.subr.bf16.mxu1 %v3673_v7  ;;  %2244 = vmatprep.subr.bf16.mxu0 %v3673_v7  ;;  %v1014_v25 = vmul.f32 0.6931472, %v2391_v31 }
 0x1d6   : > { %v1016_v5 = vmul.f32 %v1015_v0, %v1012_v29  ;;  %v3292_v29 = vsub.f32 %v3067_v21, %v1052_v57  ;;  %v3664_v21 = vand.u32 4294901760, %v3278_v13  ;;  %v3663_v57 = vand.u32 4294901760, %v3283_v24 }
 0x1d7   : > { %v1017_v27 = vmul.f32 %v1015_v0, %v1014_v25  ;;  %v3297_v25 = vsub.f32 %v3072_v17, %v1055_v3  ;;  %v3317_v17 = vld [vmem:[%s3636_s2 + $0xb0] sm:$0xff]  ;;  %v3322_v3 = vld [vmem:[%s3636_s2 + $0xb8] sm:$0xff] }
 0x1d8   : > { %2138 = vmatpush1.bf16.msra.mxu1 %v3158_v11  ;;  %2246 = vmatpush1.bf16.msra.mxu0 %v3158_v11  ;;  %v1018_v15 = vmul.f32 1.442695, %v1016_v5  ;;  %v3308_v5 = vpack.c.bf16 %v3661_v23, %v3662_v10  ;;  %v1159_v23 = vand.u32 4294901760, %v3292_v29 }
 0x1d9   : > { %2139 = vmatprep.subr.bf16.mxu1 %v3673_v7  ;;  %2247 = vmatprep.subr.bf16.mxu0 %v3673_v7  ;;  %v1020_v16 = vmul.f32 1.442695, %v1017_v27  ;;  %v1166_v10 = vand.u32 4294901760, %v3297_v25 }
 0x1da   : > { %2392 = vpow2.f32 %v1018_v15  ;;  %v3328_v15 = vsub.f32 %v3077_v18, %v1058_v36  ;;  %v3347_v18 = vpack.c.bf16 %v3663_v57, %v3664_v21  ;;  %v3667_v36 = vand.u32 4294901760, %v3322_v3 }
 0x1db   : > { %2394 = vpow2.f32 %v1020_v16  ;;  %v1160_v63 = vsub.f32 %v3292_v29, %v1159_v23  ;;  %v1167_v62 = vsub.f32 %v3297_v25, %v1166_v10 }
 0x1dc   : > { %2141 = vmatpush1.bf16.msra.mxu1 %v3181_v58  ;;  %2249 = vmatpush1.bf16.msra.mxu0 %v3181_v58  ;;  %v1173_v21 = vand.u32 4294901760, %v3328_v15 }
 0x1dd   : > { %2142 = vmatprep.subr.bf16.mxu1 %v3673_v7  ;;  %2250 = vmatprep.subr.bf16.mxu0 %v3673_v7  ;;  %v1168_v42 = vand.u32 4294901760, %v1167_v62  ;;  %v2272_v62 = vpack.c.bf16 %v1166_v10, %v1159_v23  ;;  %v3710_v10 = vand.u32 4294901760, %v3172_v14 }
 0x1df   : > { %v3429_v23 = vsub.f32 %v3172_v14, %v3710_v10 }
 0x1e0   : > { %2144 = vmatpush1.bf16.msra.mxu1 %v3203_v22  ;;  %2252 = vmatpush1.bf16.msra.mxu0 %v3203_v22 }
 0x1e1   : > { %2145 = vmatprep.subr.bf16.mxu1 %v3673_v7  ;;  %2253 = vmatprep.subr.bf16.mxu0 %v3673_v7  ;;  %v1236_v10 = vand.u32 4294901760, %v3429_v23 }
 0x1e4   : > { %2147 = vmatpush1.bf16.msra.mxu1 %v3225_v40  ;;  %2255 = vmatpush1.bf16.msra.mxu0 %v3225_v40  ;;  %v2393_v4 = vpop.eup %2392 }
 0x1e5   : > { %2148 = vmatprep.subr.bf16.mxu1 %v3673_v7  ;;  %2256 = vmatprep.subr.bf16.mxu0 %v3673_v7  ;;  %v2395_v8 = vpop.eup %2394  ;;  %v3287_v31 = vand.u32 4294901760, %v2393_v4 }
 0x1e6   : > { %v1049_v35 = vsel %vm1047_vm2, %v2395_v8, 0  ;;  %v3336_v8 = vsub.f32 %v3086_v43, %v1061_v39  ;;  %v3668_v43 = vand.u32 4294901760, %v3317_v17 }
 0x1e7   : > { %v3285_v32 = vand.u32 4294901760, %v1049_v35  ;;  %v3331_v16 = vsub.f32 %v2393_v4, %v3287_v31  ;;  %v3356_v4 = vsub.f32 %v3094_v20, %v1064_v59  ;;  %v3386_v59 = vld [vmem:[%s3636_s2 + $0xc0] sm:$0xff] }
 0x1e8   : > { %2150 = vmatpush1.bf16.msra.mxu1 %v3247_v61  ;;  %2258 = vmatpush1.bf16.msra.mxu0 %v3247_v61  ;;  %v3374_v20 = vpack.c.bf16 %v3667_v36, %v3668_v43  ;;  %v3401_v30 = vand.u32 4294901760, %v3386_v59 }
 0x1e9   : > { %2151 = vmatprep.subr.bf16.mxu1 %v3673_v7  ;;  %2259 = vmatprep.subr.bf16.mxu0 %v3673_v7  ;;  %v3300_v0 = vsub.f32 %v1049_v35, %v3285_v32  ;;  %3707 = vst [vmem:[#allocation9_spill] sm:$0xff] %v3331_v16  ;;  %v1148_v57 = vand.u32 4294901760, %v3331_v16  ;;  %v1187_v36 = vand.u32 4294901760, %v3356_v4 }
 0x1ea   : > { %3708 = vst [vmem:[#allocation10_spill] sm:$0xff] %v3374_v20 }
 0x1eb   : > { %v1142_v27 = vand.u32 4294901760, %v3300_v0  ;;  %v1188_v50 = vsub.f32 %v3356_v4, %v1187_v36 }
 0x1ec   : > { %2153 = vmatpush1.bf16.msra.mxu1 %v3269_v51  ;;  %2261 = vmatpush1.bf16.msra.mxu0 %v3269_v51 }
 0x1ed   : > { %2154 = vmatprep.subr.bf16.mxu1 %v3673_v7  ;;  %2262 = vmatprep.subr.bf16.mxu0 %v3673_v7  ;;  %v1143_v35 = vsub.f32 %v3300_v0, %v1142_v27 }
 0x1ee   : > { %1569 = vmatprep.mubr.f32.mxu0 %v1142_v27  ;;  %v3361_v27 = vsub.f32 %v3099_v54, %v1067_v52  ;;  %v3379_v54 = vsub.f32 %v3123_v60, %v1070_v49  ;;  %v1149_v52 = vsub.f32 %v3331_v16, %v1148_v57  ;;  %v3395_v60 = vsub.f32 %v3128_v6, %v1073_v53 }
 0x1ef   : > { %v1144_v39 = vand.u32 4294901760, %v1143_v35  ;;  %v1180_v35 = vand.u32 4294901760, %v3336_v8  ;;  %v1161_v49 = vand.u32 4294901760, %v1160_v63  ;;  %v3411_v6 = vsub.f32 %v3150_v2, %v1079_v45 }
 0x1f0   : > { %2156 = vmatpush1.bf16.msra.mxu1 %v3308_v5  ;;  %2264 = vmatpush1.bf16.msra.mxu0 %v3308_v5  ;;  %v1194_v43 = vand.u32 4294901760, %v3361_v27  ;;  %v3679_v53 = vmov 0.0   ;;  %v1150_v63 = vand.u32 4294901760, %v1149_v52  ;;  %v1201_v26 = vand.u32 4294901760, %v3379_v54 }
 0x1f1   : > { %2157 = vmatprep.subr.bf16.mxu1 %v3673_v7  ;;  %2265 = vmatprep.subr.bf16.mxu0 %v3673_v7  ;;  %v1181_v41 = vsub.f32 %v3336_v8, %v1180_v35  ;;  %v2164_v16 = vpack.c.bf16 %v1168_v42, %v1161_v49  ;;  %v3709_v2 = vand.u32 4294901760, %v3167_v46  ;;  %v3711_v42 = vmov 0.0|0.0  }
 0x1f2   : > { %1145 = vmatprep.mubr.f32.mxu1 %v1144_v39  ;;  %v1174_v39 = vsub.f32 %v3328_v15, %v1173_v21  ;;  %v1195_v9 = vsub.f32 %v3361_v27, %v1194_v43  ;;  %v1189_v52 = vand.u32 4294901760, %v1188_v50  ;;  %v1215_v49 = vand.u32 4294901760, %v3406_v28 }
 0x1f3   : > { %v1182_v47 = vand.u32 4294901760, %v1181_v41  ;;  %v3424_v45 = vsub.f32 %v3167_v46, %v3709_v2  ;;  %v2275_v41 = vpack.c.bf16 %v1180_v35, %v1173_v21  ;;  %v1202_v2 = vsub.f32 %v3379_v54, %v1201_v26 }
 0x1f4   : > { %2159 = vmatpush1.bf16.msra.mxu1 %v3347_v18  ;;  %2267 = vmatpush1.bf16.msra.mxu0 %v3347_v18  ;;  %v1222_v14 = vand.u32 4294901760, %v3411_v6  ;;  %v1216_v35 = vsub.f32 %v3406_v28, %v1215_v49 }
 0x1f5   : > { %2160 = vmatprep.subr.bf16.mxu1 %v3673_v7  ;;  %2268 = vmatprep.subr.bf16.mxu0 %v3673_v7  ;;  %v1175_v7 = vand.u32 4294901760, %v1174_v39  ;;  %v1196_v39 = vand.u32 4294901760, %v1195_v9  ;;  %v3713_v9 = vand.u32 4294901760, %v3195_v12 }
 0x1f7   : > { %v2167_v46 = vpack.c.bf16 %v1182_v47, %v1175_v7  ;;  %v3447_v21 = vsub.f32 %v3195_v12, %v3713_v9  ;;  %v2170_v7 = vpack.c.bf16 %v1196_v39, %v1189_v52  ;;  %v1223_v47 = vsub.f32 %v3411_v6, %v1222_v14 }
 0x1f8   : > { %2162 = vmatpush1.bf16.msra.mxu1 %v3374_v20  ;;  %2270 = vmatpush1.bf16.msra.mxu0 %v3374_v20  ;;  %v1208_v20 = vand.u32 4294901760, %v3395_v60  ;;  %v3714_v12 = vand.u32 4294901760, %v3212_v34 }
 0x1f9   : > { %1123 = vmatprep.subr.mxu1 %v3679_v53  ;;  %1549 = vmatprep.subr.mxu0 %v3679_v53  ;;  %v1224_v9 = vand.u32 4294901760, %v1223_v47 }
 0x1fa   : > { %v1209_v53 = vsub.f32 %v3395_v60, %v1208_v20 }
 0x1fc   : > { %1125 = vmatpush1.msra.mxu1 %v3401_v30  ;;  %1551 = vmatpush1.msra.mxu0 %v3401_v30 }
 0x1fd   : > { %2163 = vmatprep.subr.bf16.mxu1 %v3711_v42  ;;  %2271 = vmatprep.subr.bf16.mxu0 %v3711_v42 }
 0x1fe   : > { %1151 = vmatmul.mubr.f32.vlgmr.msra.gmra.mrb[0].mxu1 %v1150_v63  ;;  %1573 = vmatmul.mubr.f32.vlgmr.msra.gmra.mrb[0].mxu0 %v1148_v57  ;;  %v3712_v57 = vand.u32 4294901760, %v3190_v1  ;;  %v1203_v63 = vand.u32 4294901760, %v1202_v2 }
 0x1ff   : > { %2165 = vmatpush1.bf16.msra.mxu1 %v2164_v16  ;;  %2273 = vmatpush1.bf16.msra.mxu0 %v2272_v62  ;;  %v2278_v16 = vpack.c.bf16 %v1194_v43, %v1187_v36  ;;  %v1229_v62 = vand.u32 4294901760, %v3424_v45  ;;  %v3460_v43 = vsub.f32 %v3212_v34, %v3714_v12  ;;  %v3715_v36 = vand.u32 4294901760, %v3217_v37 }
 0x200   : > { %2166 = vmatprep.subr.bf16.mxu1 %v3711_v42  ;;  %2274 = vmatprep.subr.bf16.mxu0 %v3711_v42  ;;  %v3442_v50 = vsub.f32 %v3190_v1, %v3712_v57  ;;  %v1210_v1 = vand.u32 4294901760, %v1209_v53  ;;  %v1217_v57 = vand.u32 4294901760, %v1216_v35  ;;  %v1237_v34 = vsub.f32 %v3429_v23, %v1236_v10 }
 0x201   : > { %1346 = vmatprep.mubr.f32.mxu1 %v3285_v32  ;;  %1718 = vmatprep.mubr.f32.mxu0 %v3285_v32  ;;  %v3465_v52 = vsub.f32 %v3217_v37, %v3715_v36  ;;  %v1230_v53 = vsub.f32 %v3424_v45, %v1229_v62  ;;  %v3716_v37 = vand.u32 4294901760, %v3234_v48  ;;  %v1257_v36 = vand.u32 4294901760, %v3460_v43 }
 0x202   : > { %v1243_v39 = vand.u32 4294901760, %v3442_v50  ;;  %v2173_v2 = vpack.c.bf16 %v1210_v1, %v1203_v63  ;;  %v2176_v1 = vpack.c.bf16 %v1224_v9, %v1217_v57  ;;  %v1238_v47 = vand.u32 4294901760, %v1237_v34 }
 0x203   : > { %2168 = vmatpush1.bf16.msra.mxu1 %v2167_v46  ;;  %2276 = vmatpush1.bf16.msra.mxu0 %v2275_v41  ;;  %v2281_v41 = vpack.c.bf16 %v1208_v20, %v1201_v26  ;;  %v1250_v46 = vand.u32 4294901760, %v3447_v21  ;;  %v3476_v20 = vsub.f32 %v3234_v48, %v3716_v37  ;;  %v3717_v26 = vand.u32 4294901760, %v3239_v55 }
 0x204   : > { %2169 = vmatprep.subr.bf16.mxu1 %v3711_v42  ;;  %2277 = vmatprep.subr.bf16.mxu0 %v3711_v42  ;;  %v1244_v35 = vsub.f32 %v3442_v50, %v1243_v39  ;;  %v1264_v48 = vand.u32 4294901760, %v3465_v52  ;;  %v1258_v37 = vsub.f32 %v3460_v43, %v1257_v36 }
 0x205   : > { %v3481_v12 = vsub.f32 %v3239_v55, %v3717_v26  ;;  %v1251_v63 = vsub.f32 %v3447_v21, %v1250_v46  ;;  %v3718_v55 = vand.u32 4294901760, %v3256_v33  ;;  %v1271_v9 = vand.u32 4294901760, %v3476_v20 }
 0x206   : > { %v1265_v26 = vsub.f32 %v3465_v52, %v1264_v48 }
 0x207   : > { %2171 = vmatpush1.bf16.msra.mxu1 %v2170_v7  ;;  %2279 = vmatpush1.bf16.msra.mxu0 %v2278_v16  ;;  %v2284_v7 = vpack.c.bf16 %v1222_v14, %v1215_v49  ;;  %v1231_v16 = vand.u32 4294901760, %v1230_v53  ;;  %v3492_v49 = vsub.f32 %v3256_v33, %v3718_v55  ;;  %v3719_v14 = vand.u32 4294901760, %v3261_v44 }
 0x208   : > { %2172 = vmatprep.subr.bf16.mxu1 %v3711_v42  ;;  %2280 = vmatprep.subr.bf16.mxu0 %v3711_v42  ;;  %v1252_v57 = vand.u32 4294901760, %v1251_v63  ;;  %v1278_v33 = vand.u32 4294901760, %v3481_v12  ;;  %v1259_v55 = vand.u32 4294901760, %v1258_v37 }
 0x209   : > { %v3497_v53 = vsub.f32 %v3261_v44, %v3719_v14  ;;  %v2179_v34 = vpack.c.bf16 %v1238_v47, %v1231_v16  ;;  %v3720_v44 = vand.u32 4294901760, %v3278_v13  ;;  %v2290_v16 = vpack.c.bf16 %v1250_v46, %v1243_v39 }
 0x20a   : > { %v1285_v63 = vand.u32 4294901760, %v3492_v49  ;;  %v1266_v14 = vand.u32 4294901760, %v1265_v26  ;;  %v3723_v46 = vand.u32 4294901760, %v3322_v3 }
 0x20b   : > { %2174 = vmatpush1.bf16.msra.mxu1 %v2173_v2  ;;  %2282 = vmatpush1.bf16.msra.mxu0 %v2281_v41  ;;  %v2287_v41 = vpack.c.bf16 %v1236_v10, %v1229_v62  ;;  %v1245_v2 = vand.u32 4294901760, %v1244_v35  ;;  %v3508_v62 = vsub.f32 %v3278_v13, %v3720_v44  ;;  %v3721_v10 = vand.u32 4294901760, %v3283_v24 }
 0x20c   : > { %2175 = vmatprep.subr.bf16.mxu1 %v3711_v42  ;;  %2283 = vmatprep.subr.bf16.mxu0 %v3711_v42  ;;  %v1272_v35 = vsub.f32 %v3476_v20, %v1271_v9  ;;  %v1279_v13 = vsub.f32 %v3481_v12, %v1278_v33  ;;  %v3529_v44 = vsub.f32 %v3322_v3, %v3723_v46 }
 0x20d   : > { %v2182_v47 = vpack.c.bf16 %v1252_v57, %v1245_v2  ;;  %v1286_v57 = vsub.f32 %v3492_v49, %v1285_v63  ;;  %v2185_v37 = vpack.c.bf16 %v1266_v14, %v1259_v55  ;;  %v2296_v3 = vpack.c.bf16 %v1278_v33, %v1271_v9 }
 0x20e   : > { %v1273_v2 = vand.u32 4294901760, %v1272_v35  ;;  %v1280_v26 = vand.u32 4294901760, %v1279_v13  ;;  %v1320_v55 = vand.u32 4294901760, %v3529_v44  ;;  %v3545_v9 = vsub.f32 %v3386_v59, %v3401_v30 }
 0x20f   : > { %2177 = vmatpush1.bf16.msra.mxu1 %v2176_v1  ;;  %2285 = vmatpush1.bf16.msra.mxu0 %v2284_v7  ;;  %v3513_v7 = vsub.f32 %v3283_v24, %v3721_v10  ;;  %v1292_v1 = vand.u32 4294901760, %v3497_v53  ;;  %v3722_v24 = vand.u32 4294901760, %v3317_v17  ;;  %v1299_v10 = vand.u32 4294901760, %v3508_v62 }
 0x210   : > { %2178 = vmatprep.subr.bf16.mxu1 %v3711_v42  ;;  %2286 = vmatprep.subr.bf16.mxu0 %v3711_v42  ;;  %v2188_v35 = vpack.c.bf16 %v1280_v26, %v1273_v2  ;;  %v1321_v2 = vsub.f32 %v3529_v44, %v1320_v55 }
 0x211   : > { %v3524_v39 = vsub.f32 %v3317_v17, %v3722_v24  ;;  %v1306_v17 = vand.u32 4294901760, %v3513_v7  ;;  %v1287_v24 = vand.u32 4294901760, %v1286_v57  ;;  %v2299_v14 = vpack.c.bf16 %v1292_v1, %v1285_v63 }
 0x212   : > { %v1327_v63 = vand.u32 4294901760, %v3545_v9 }
 0x213   : > { %2180 = vmatpush1.bf16.msra.mxu1 %v2179_v34  ;;  %2288 = vmatpush1.bf16.msra.mxu0 %v2287_v41  ;;  %v2293_v41 = vpack.c.bf16 %v1264_v48, %v1257_v36  ;;  %v1293_v34 = vsub.f32 %v3497_v53, %v1292_v1  ;;  %v1313_v48 = vand.u32 4294901760, %v3524_v39  ;;  %v2302_v57 = vpack.c.bf16 %v1306_v17, %v1299_v10 }
 0x214   : > { %2181 = vmatprep.subr.bf16.mxu1 %v3711_v42  ;;  %2289 = vmatprep.subr.bf16.mxu0 %v3711_v42 }
 0x215   : > { %v1294_v36 = vand.u32 4294901760, %v1293_v34  ;;  %v2305_v26 = vpack.c.bf16 %v1320_v55, %v1313_v48 }
 0x217   : > { %2183 = vmatpush1.bf16.msra.mxu1 %v2182_v47  ;;  %2291 = vmatpush1.bf16.msra.mxu0 %v2290_v16  ;;  %v1300_v16 = vsub.f32 %v3508_v62, %v1299_v10  ;;  %v1307_v47 = vsub.f32 %v3513_v7, %v1306_v17  ;;  %v2191_v33 = vpack.c.bf16 %v1294_v36, %v1287_v24  ;;  %v3724_v17 = vmov 0.0  }
 0x218   : > { %2184 = vmatprep.subr.bf16.mxu1 %v3711_v42  ;;  %2292 = vmatprep.subr.bf16.mxu0 %v3711_v42  ;;  %v2200_v24 = vpack.c.bf16 %v3297_v25, %v3292_v29  ;;  %v2203_v36 = vpack.c.bf16 %v3336_v8, %v3328_v15  ;;  %v2206_v29 = vpack.c.bf16 %v3361_v27, %v3356_v4  ;;  %v1825_v27 = vstv %s2476_s21 }
 0x219   : > { %v1301_v13 = vand.u32 4294901760, %v1300_v16  ;;  %v1308_v46 = vand.u32 4294901760, %v1307_v47 }
 0x21b   : > { %2186 = vmatpush1.bf16.msra.mxu1 %v2185_v37  ;;  %2294 = vmatpush1.bf16.msra.mxu0 %v2293_v41  ;;  %v1314_v41 = vsub.f32 %v3524_v39, %v1313_v48  ;;  %v2194_v34 = vpack.c.bf16 %v1308_v46, %v1301_v13  ;;  %v1322_v37 = vand.u32 4294901760, %v1321_v2 }
 0x21c   : > { %2187 = vmatprep.subr.bf16.mxu1 %v3711_v42  ;;  %2295 = vmatprep.subr.bf16.mxu0 %v3711_v42 }
 0x21d   : > { %v1315_v59 = vand.u32 4294901760, %v1314_v41 }
 0x21f   : > { %2189 = vmatpush1.bf16.msra.mxu1 %v2188_v35  ;;  %2297 = vmatpush1.bf16.msra.mxu0 %v2296_v3  ;;  %v2197_v1 = vpack.c.bf16 %v1322_v37, %v1315_v59  ;;  %v1328_v3 = vsub.f32 %v3545_v9, %v1327_v63 }
 0x220   : > { %2190 = vmatprep.subr.bf16.mxu1 %v3711_v42  ;;  %2298 = vmatprep.subr.bf16.mxu0 %v3711_v42 }
 0x221   : > { %v1329_v10 = vand.u32 4294901760, %v1328_v3 }
 0x223   : > { %2192 = vmatpush1.bf16.msra.mxu1 %v2191_v33  ;;  %2300 = vmatpush1.bf16.msra.mxu0 %v2299_v14 }
 0x224   : > { %2193 = vmatprep.subr.bf16.mxu1 %v3711_v42  ;;  %2301 = vmatprep.subr.bf16.mxu0 %v3711_v42 }
 0x227   : > { %2195 = vmatpush1.bf16.msra.mxu1 %v2194_v34  ;;  %2303 = vmatpush1.bf16.msra.mxu0 %v2302_v57 }
 0x228   : > { %2196 = vmatprep.subr.bf16.mxu1 %v3711_v42  ;;  %2304 = vmatprep.subr.bf16.mxu0 %v3711_v42 }
 0x22b   : > { %2198 = vmatpush1.bf16.msra.mxu1 %v2197_v1  ;;  %2306 = vmatpush1.bf16.msra.mxu0 %v2305_v26 }
 0x22c   : > { %1324 = vmatprep.subr.mxu1 %v3724_v17  ;;  %1698 = vmatprep.subr.mxu0 %v3724_v17 }
 0x22f   : > { %1330 = vmatpush1.msra.mxu1 %v1329_v10  ;;  %1702 = vmatpush1.msra.mxu0 %v1327_v63 }
 0x230   : > { %2199 = vmatprep.subr.bf16.mxu1 %v3711_v42  ;;  %2307 = vmatprep.subr.bf16.mxu0 %v3711_v42 }
 0x231   : > { %1348 = vmatmul.mubr.f32.vlgmr.msra.gmra.mrb[0].mxu1 %v3287_v31  ;;  %1720 = vmatmul.mubr.f32.vlgmr.msra.gmra.mrb[0].mxu0 %v3287_v31 }
 0x232   : > { %2201 = vmatpush1.bf16.msra.mxu1 %v2200_v24  ;;  %2309 = vmatpush1.bf16.msra.mxu0 %v3106_v56  ;;  %v2209_v56 = vpack.c.bf16 %v3395_v60, %v3379_v54 }
 0x233   : > { %2202 = vmatprep.subr.bf16.mxu1 %v3711_v42  ;;  %2310 = vmatprep.subr.bf16.mxu0 %v3711_v42 }
 0x234   : > { %1469 = vmatprep.mubr.f32.mxu1 %v3300_v0  ;;  %1815 = vmatprep.mubr.f32.mxu0 %v3285_v32  ;;  %v3726_v32 = vld [vmem:[#allocation9_spill] sm:$0xff] }
 0x236   : > { %2204 = vmatpush1.bf16.msra.mxu1 %v2203_v36  ;;  %2312 = vmatpush1.bf16.msra.mxu0 %v3114_v19  ;;  %v2212_v19 = vpack.c.bf16 %v3411_v6, %v3406_v28  ;;  %v2227_v28 = vpack.c.bf16 %v3497_v53, %v3492_v49 }
 0x237   : > { %2205 = vmatprep.subr.bf16.mxu1 %v3711_v42  ;;  %2313 = vmatprep.subr.bf16.mxu0 %v3711_v42 }
 0x23a   : > { %2207 = vmatpush1.bf16.msra.mxu1 %v2206_v29  ;;  %2315 = vmatpush1.bf16.msra.mxu0 %v3136_v38  ;;  %v2215_v38 = vpack.c.bf16 %v3429_v23, %v3424_v45 }
 0x23b   : > { %2208 = vmatprep.subr.bf16.mxu1 %v3711_v42  ;;  %2316 = vmatprep.subr.bf16.mxu0 %v3711_v42 }
 0x23e   : > { %2210 = vmatpush1.bf16.msra.mxu1 %v2209_v56  ;;  %2318 = vmatpush1.bf16.msra.mxu0 %v3158_v11  ;;  %v2218_v11 = vpack.c.bf16 %v3447_v21, %v3442_v50 }
 0x23f   : > { %2211 = vmatprep.subr.bf16.mxu1 %v3711_v42  ;;  %2319 = vmatprep.subr.bf16.mxu0 %v3711_v42 }
 0x242   : > { %2213 = vmatpush1.bf16.msra.mxu1 %v2212_v19  ;;  %2321 = vmatpush1.bf16.msra.mxu0 %v3181_v58  ;;  %v2221_v58 = vpack.c.bf16 %v3465_v52, %v3460_v43 }
 0x243   : > { %2214 = vmatprep.subr.bf16.mxu1 %v3711_v42  ;;  %2322 = vmatprep.subr.bf16.mxu0 %v3711_v42 }
 0x246   : > { %2216 = vmatpush1.bf16.msra.mxu1 %v2215_v38  ;;  %2324 = vmatpush1.bf16.msra.mxu0 %v3203_v22  ;;  %v2224_v22 = vpack.c.bf16 %v3481_v12, %v3476_v20 }
 0x247   : > { %2217 = vmatprep.subr.bf16.mxu1 %v3711_v42  ;;  %2325 = vmatprep.subr.bf16.mxu0 %v3711_v42 }
 0x24a   : > { %2219 = vmatpush1.bf16.msra.mxu1 %v2218_v11  ;;  %2327 = vmatpush1.bf16.msra.mxu0 %v3225_v40  ;;  %v2230_v40 = vpack.c.bf16 %v3513_v7, %v3508_v62 }
 0x24b   : > { %2220 = vmatprep.subr.bf16.mxu1 %v3711_v42  ;;  %2328 = vmatprep.subr.bf16.mxu0 %v3711_v42 }
 0x24e   : > { %2222 = vmatpush1.bf16.msra.mxu1 %v2221_v58  ;;  %2330 = vmatpush1.bf16.msra.mxu0 %v3247_v61  ;;  %v2233_v61 = vpack.c.bf16 %v3529_v44, %v3524_v39 }
 0x24f   : > { %2223 = vmatprep.subr.bf16.mxu1 %v3711_v42  ;;  %2331 = vmatprep.subr.bf16.mxu0 %v3711_v42 }
 0x252   : > { %2225 = vmatpush1.bf16.msra.mxu1 %v2224_v22  ;;  %2333 = vmatpush1.bf16.msra.mxu0 %v3269_v51  ;;  %v3725_v51 = vld [vmem:[#allocation10_spill] sm:$0xff] }
 0x253   : > { %2226 = vmatprep.subr.bf16.mxu1 %v3711_v42  ;;  %2334 = vmatprep.subr.bf16.mxu0 %v3711_v42 }
 0x256   : > { %2228 = vmatpush1.bf16.msra.mxu1 %v2227_v28  ;;  %2336 = vmatpush1.bf16.msra.mxu0 %v3308_v5 }
 0x257   : > { %2229 = vmatprep.subr.bf16.mxu1 %v3711_v42  ;;  %2337 = vmatprep.subr.bf16.mxu0 %v3711_v42 }
 0x25a   : > { %2231 = vmatpush1.bf16.msra.mxu1 %v2230_v40  ;;  %2339 = vmatpush1.bf16.msra.mxu0 %v3347_v18 }
 0x25b   : > { %2232 = vmatprep.subr.bf16.mxu1 %v3711_v42  ;;  %2340 = vmatprep.subr.bf16.mxu0 %v3711_v42 }
 0x25e   : > { %2234 = vmatpush1.bf16.msra.mxu1 %v2233_v61  ;;  %2342 = vmatpush1.bf16.msra.mxu0 %v3725_v51 }
 0x25f   : > { %1449 = vmatprep.subr.mxu1 %v3724_v17  ;;  %1797 = vmatprep.subr.mxu0 %v3724_v17 }
 0x262   : > { %1452 = vmatpush1.msra.mxu1 %v3545_v9  ;;  %1799 = vmatpush1.msra.mxu0 %v3401_v30 }
 0x263   : > { %1472 = vmatmul.mubr.f32.vlgmr.msra.gmra.mrb[0].mxu1 %v3726_v32  ;;  %1817 = vmatmul.mubr.f32.vlgmr.msra.gmra.mrb[0].mxu0 %v3287_v31 }
 0x336   : > { %v1473_v25 = vpop.f32.mrb[0].mxu1  ;;  %v1818_v0 = vpop.f32.mrb[0].mxu0 }
 0x337   : > { %v2352_v5 = vadd.f32 %v1818_v0, %v1473_v25  ;;  %v1475_v15 = vpop.f32.mrb[1].mxu1  ;;  %v1820_v8 = vpop.f32.mrb[1].mxu0 }
 0x339   : > { %v1822_v18 = vmul.f32 0.01, %v2352_v5 }
 0x33b   : > { %2396 = vlog2.f32 %v1822_v18 }
 0x345   : > { %v2397_v4 = vpop.eup %2396 }
 0x346   : > { %v1824_v54 = vmul.f32 0.6931472, %v2397_v4 }
 0x348   : > { %v1826_v60 = vmul.f32 %v1825_v27, %v1824_v54 }
 0x34a   : > { %v1827_v6 = vmul.f32 1.442695, %v1826_v60 }
 0x34c   : > { %2398 = vpow2.f32 %v1827_v6 }
 0x356   : > { %v2399_v30 = vpop.eup %2398 }
 0x357   : > { %1830 = vst.msk [vmem:[%s2486_s30] sm:$0xff] %vm1829_vm3, %v2399_v30 }
 0x358 PF: > { %s14_s12 = sadd.s32 1, %s2425_s12  }
 0x359   : > { %p11_p3 = scmp.ge.s32.totalorder %s14_s12, 4  }
 0x35b   :  { %13 = sbr.rel (!%p11_p3) target bundleno = 1 (0x1), region = 75 }
 0x362   :  { %1850 = vsyncpa [#allocation3], 1 }
 0x363   :  { %1852 = vsyncpa [#allocation3 + $0x1], 1 }

</bundles_post_ra>
